<compile_context>
chip_gen: v6e
topology: v6e:2x2x1
jax: 0.10.0
libtpu: 0.0.40
codegen_flags: <defaults>
</compile_context>

<pallas_src>
import jax
import jax.numpy as jnp
from jax.experimental import pallas as pl
from jax.experimental.pallas import tpu as pltpu

_LANE = 128
_SUBLANE = 8


def _round_up(x, m):
    return ((x + m - 1) // m) * m


def _fused_mlp_kernel(x_ref, w_ref, b_ref, o_ref):
    """Single invocation: statically-unrolled layer loop, activation in regs."""
    n_layers = w_ref.shape[0]
    act = x_ref[...]
    for l in range(n_layers):  # static unroll (L+1 is small and known)
        act = (
            jnp.dot(act, w_ref[l], preferred_element_type=jnp.float32)
            + b_ref[l]
        )
    o_ref[...] = act.astype(o_ref.dtype)


def testnet_forward_pallas(x_pad, w_stack, b_stack):
    """Fused TestNet forward.

    x_pad:   [Bp, Dp]        zero-padded input activations
    w_stack: [L+1, Dp, Dp]   zero-padded per-layer weights ([in, out] layout)
    b_stack: [L+1, 1, Dp]    zero-padded per-layer biases
    Returns padded output [Bp, Dp]; caller slices [:B, :K].
    """
    n_layers, Dp, _ = w_stack.shape
    Bp = x_pad.shape[0]

    flops = 2 * Bp * Dp * Dp * n_layers
    bytes_accessed = 4 * (w_stack.size + b_stack.size + x_pad.size + Bp * Dp)

    return pl.pallas_call(
        _fused_mlp_kernel,
        out_shape=jax.ShapeDtypeStruct((Bp, Dp), x_pad.dtype),
        # No grid: one invocation, whole arrays resident in VMEM
        # (all weights + activations total ~0.25 MiB at these shapes).
        in_specs=[
            pl.BlockSpec(memory_space=pltpu.MemorySpace.VMEM),  # x
            pl.BlockSpec(memory_space=pltpu.MemorySpace.VMEM),  # weights
            pl.BlockSpec(memory_space=pltpu.MemorySpace.VMEM),  # biases
        ],
        out_specs=pl.BlockSpec(memory_space=pltpu.MemorySpace.VMEM),
        cost_estimate=pl.CostEstimate(
            flops=flops, transcendentals=0, bytes_accessed=bytes_accessed
        ),
    )(x_pad, w_stack, b_stack)


def init_testnet_params(key, D, K, L):
    """Mimics TestNet.__init__:

    weight ~ uniform(-1, 1)                      (explicit init in the module)
    bias   ~ uniform(-1/sqrt(fan_in), 1/sqrt..)  (nn.Linear default)
    Weights stored [in, out] (transposed vs PyTorch's [out, in]).
    Returns lists of L+1 (weight, bias) where the last entry is the logits layer.
    """
    bound = 1.0 / jnp.sqrt(jnp.float32(D))
    ws, bs = [], []
    for _ in range(L):
        key, kw, kb = jax.random.split(key, 3)
        ws.append(jax.random.uniform(kw, (D, D), jnp.float32, -1.0, 1.0))
        bs.append(jax.random.uniform(kb, (1, D), jnp.float32, -bound, bound))
    key, kw, kb = jax.random.split(key, 3)
    ws.append(jax.random.uniform(kw, (D, K), jnp.float32, -1.0, 1.0))
    bs.append(jax.random.uniform(kb, (1, K), jnp.float32, -bound, bound))
    return ws, bs


def pack_params(ws, bs, Dp):
    """Zero-pad every layer to [Dp, Dp] / [1, Dp] and stack along a layer axis.

    Done once at setup time (not in the per-call hot path).
    """
    n = len(ws)
    w_stack = jnp.zeros((n, Dp, Dp), jnp.float32)
    b_stack = jnp.zeros((n, 1, Dp), jnp.float32)
    for i, (w, b) in enumerate(zip(ws, bs)):
        w_stack = w_stack.at[i, : w.shape[0], : w.shape[1]].set(w)
        b_stack = b_stack.at[i, :, : b.shape[1]].set(b)
    return w_stack, b_stack


if __name__ == "__main__":
    # Shapes consistent with the module defaults (D=100, K=10), small batch.
    B, D, K, L = 8, 100, 10, 2

    Dp = _round_up(max(D, K), _LANE)  # 128 (lane-dense feature dim)
    Bp = _round_up(B, _SUBLANE)       # 8

    key = jax.random.PRNGKey(0)
    key, kx = jax.random.split(key)
    x = jax.random.normal(kx, (B, D), jnp.float32)

    ws, bs = init_testnet_params(key, D, K, L)
    w_stack, b_stack = pack_params(ws, bs, Dp)

    # One-time zero-pad of the input, outside the jitted hot path.
    x_pad = jnp.zeros((Bp, Dp), jnp.float32).at[:B, :D].set(x)
    x_pad, w_stack, b_stack = jax.block_until_ready((x_pad, w_stack, b_stack))

    fwd = jax.jit(testnet_forward_pallas)
    out_pad = jax.block_until_ready(fwd(x_pad, w_stack, b_stack))
    out = out_pad[:B, :K]

    # Plain-JAX reference of the same math (unpadded).
    ref = x
    for w, b in zip(ws, bs):
        ref = ref @ w + b

    assert out.shape == (B, K)
    max_err = float(jnp.max(jnp.abs(out - ref)))
    assert jnp.allclose(out, ref, rtol=1e-3, atol=1e-2), f"max_abs_err={max_err}"

    print("KERNEL_OK")
</pallas_src>

<mosaic_0001>
module attributes {stable_mosaic.version = 11 : i64} {
  func.func @_fused_mlp_kernel(%arg0: memref<8x128xf32, #tpu.memory_space<vmem>>, %arg1: memref<3x128x128xf32, #tpu.memory_space<vmem>>, %arg2: memref<3x1x128xf32, #tpu.memory_space<vmem>>, %arg3: memref<8x128xf32, #tpu.memory_space<vmem>>) attributes {dimension_semantics = [], scalar_prefetch = 0 : i64, scratch_operands = 0 : i64, tpu.core_type = #tpu.core_type<tc>} {
    %c0 = arith.constant 0 : index
    %c0_0 = arith.constant 0 : index
    %0 = vector.load %arg0[%c0, %c0_0] : memref<8x128xf32, #tpu.memory_space<vmem>>, vector<8x128xf32>
    %c0_1 = arith.constant 0 : index
    %c0_2 = arith.constant 0 : index
    %c0_3 = arith.constant 0 : index
    %1 = vector.load %arg1[%c0_1, %c0_2, %c0_3] : memref<3x128x128xf32, #tpu.memory_space<vmem>>, vector<1x128x128xf32>
    %2 = vector.shape_cast %1 : vector<1x128x128xf32> to vector<128x128xf32>
    %cst = arith.constant dense<0.000000e+00> : vector<8x128xf32>
    %3 = tpu.matmul %0, %2, %cst {dimension_numbers = #tpu.dot_dimension_numbers<[1], [0], [0], [1], [0, 0, 1, 1], [], []>} : vector<8x128xf32>, vector<128x128xf32>, vector<8x128xf32> -> vector<8x128xf32>
    %c0_4 = arith.constant 0 : index
    %c0_5 = arith.constant 0 : index
    %c0_6 = arith.constant 0 : index
    %4 = vector.load %arg2[%c0_4, %c0_5, %c0_6] : memref<3x1x128xf32, #tpu.memory_space<vmem>>, vector<1x1x128xf32>
    %5 = vector.shape_cast %4 : vector<1x1x128xf32> to vector<1x128xf32>
    %6 = vector.broadcast %5 : vector<1x128xf32> to vector<8x128xf32>
    %7 = arith.addf %3, %6 : vector<8x128xf32>
    %c1 = arith.constant 1 : index
    %c0_7 = arith.constant 0 : index
    %c0_8 = arith.constant 0 : index
    %8 = vector.load %arg1[%c1, %c0_7, %c0_8] : memref<3x128x128xf32, #tpu.memory_space<vmem>>, vector<1x128x128xf32>
    %9 = vector.shape_cast %8 : vector<1x128x128xf32> to vector<128x128xf32>
    %cst_9 = arith.constant dense<0.000000e+00> : vector<8x128xf32>
    %10 = tpu.matmul %7, %9, %cst_9 {dimension_numbers = #tpu.dot_dimension_numbers<[1], [0], [0], [1], [0, 0, 1, 1], [], []>} : vector<8x128xf32>, vector<128x128xf32>, vector<8x128xf32> -> vector<8x128xf32>
    %c1_10 = arith.constant 1 : index
    %c0_11 = arith.constant 0 : index
    %c0_12 = arith.constant 0 : index
    %11 = vector.load %arg2[%c1_10, %c0_11, %c0_12] : memref<3x1x128xf32, #tpu.memory_space<vmem>>, vector<1x1x128xf32>
    %12 = vector.shape_cast %11 : vector<1x1x128xf32> to vector<1x128xf32>
    %13 = vector.broadcast %12 : vector<1x128xf32> to vector<8x128xf32>
    %14 = arith.addf %10, %13 : vector<8x128xf32>
    %c2 = arith.constant 2 : index
    %c0_13 = arith.constant 0 : index
    %c0_14 = arith.constant 0 : index
    %15 = vector.load %arg1[%c2, %c0_13, %c0_14] : memref<3x128x128xf32, #tpu.memory_space<vmem>>, vector<1x128x128xf32>
    %16 = vector.shape_cast %15 : vector<1x128x128xf32> to vector<128x128xf32>
    %cst_15 = arith.constant dense<0.000000e+00> : vector<8x128xf32>
    %17 = tpu.matmul %14, %16, %cst_15 {dimension_numbers = #tpu.dot_dimension_numbers<[1], [0], [0], [1], [0, 0, 1, 1], [], []>} : vector<8x128xf32>, vector<128x128xf32>, vector<8x128xf32> -> vector<8x128xf32>
    %c2_16 = arith.constant 2 : index
    %c0_17 = arith.constant 0 : index
    %c0_18 = arith.constant 0 : index
    %18 = vector.load %arg2[%c2_16, %c0_17, %c0_18] : memref<3x1x128xf32, #tpu.memory_space<vmem>>, vector<1x1x128xf32>
    %19 = vector.shape_cast %18 : vector<1x1x128xf32> to vector<1x128xf32>
    %20 = vector.broadcast %19 : vector<1x128xf32> to vector<8x128xf32>
    %21 = arith.addf %17, %20 : vector<8x128xf32>
    %c0_19 = arith.constant 0 : index
    %c0_20 = arith.constant 0 : index
    %22 = vector.load %arg3[%c0_19, %c0_20] : memref<8x128xf32, #tpu.memory_space<vmem>>, vector<8x128xf32>
    tpu.vector_store %arg3[%c0_19, %c0_20], %21 {strides = array<i32>} : memref<8x128xf32, #tpu.memory_space<vmem>>, vector<8x128xf32>,
    return
  }
}

</mosaic_0001>

<bundles_post_ra>
// kernel: testnet_forward_pallas.1
= control target key start
LH: loop header
LB: loop body
LE: loop exit
PB: predicated region body
PF: predicated region fallthrough
CT: control target
= control target key end

     0   :  { %8 = vsyncpa [#allocation3], 0  ;;  %s675_s0 = inlined_call_operand.hbm [shape: f32[8,128], index: 0, kind: input, shape index: {}]   ;;  %s676_s1 = inlined_call_operand.hbm [shape: f32[3,128,128], index: 1, kind: input, shape index: {}]   ;;  %s677_s2 = inlined_call_operand.vmem [shape: f32[3,1,128], index: 2, kind: input, shape index: {}]   ;;  %s678_s3 = inlined_call_operand.hbm [shape: f32[8,128], index: 3, kind: output, shape index: {}]  }
   0x1   :  { %9 = vsyncpa [#allocation6], 0 }
   0x2   :  { %10 = vsyncpa [#allocation4], 0  ;;  %s576_s12 = smov [#allocation2]   ;;  %s577_s14 = smov [#allocation5]  }
   0x3   :  { %s17_s13 = sshll.u32 %s576_s12, 4  ;;  %s26_s15 = sshll.u32 %s577_s14, 4  ;;  %s18_s13 = int_to_ptr.vmem [resolvable:$true] %s17_s13  ;;  %s27_s15 = int_to_ptr.vmem [resolvable:$true] %s26_s15 }
   0x4   :  { %s518_s16 = scalar_lea.vmem %s18_s13, 128  ;;  %p523_p1 = scmp.lt.s32.totalorder %s18_s13, %s18_s13 }
   0x5   :  { %p519_p0 = scmp.ne.s32.totalorder %s18_s13, %s518_s16  ;;  %p524_p2 = scmp.lt.s32.totalorder %s518_s16, %s518_s16 }
   0x7   :  { %p525_p3 = por %p524_p2, %p523_p1 }
   0x9   :  { %p526_p4 = pnand %p525_p3, %p519_p0 }
   0xb   :  { %529 = shalt.err (!%p526_p4)
}
   0xc   :  { %20 = dma.hbm_to_vmem [thread:$0]  %s675_s0, 128, %s18_s13, [#allocation3]  }
   0xd   :  { %s538_s19 = scalar_lea.vmem %s27_s15, 6144  ;;  %p543_p6 = scmp.lt.s32.totalorder %s27_s15, %s27_s15 }
   0xe   :  { %p539_p5 = scmp.ne.s32.totalorder %s27_s15, %s538_s19  ;;  %p544_p7 = scmp.lt.s32.totalorder %s538_s19, %s538_s19 }
  0x10   :  { %p545_p8 = por %p544_p7, %p543_p6 }
  0x12   :  { %p546_p9 = pnand %p545_p8, %p539_p5 }
  0x14   :  { %549 = shalt.err (!%p546_p9)
}
  0x15   :  { %s578_s20 = smov 128   ;;  %s579_s21 = smov 8  }
  0x16   :  { %32 = dma.hbm_to_vmem [thread:$0]  %s676_s1, 6144, %s27_s15, [#allocation6], %s578_s20, %s578_s20, %s579_s21  }
  0x17   :  { %570 = dma.done.wait [#allocation3], 128  }
  0x18   :  { %571 = vsyncadd [#allocation3], 4294967168 }
  0x19   :  { %572 = dma.done.wait [#allocation6], 6144  }
  0x1a   :  { %573 = vsyncadd [#allocation6], 4294961152  ;;  %v580_v0 = vmov 0.0   ;;  %vm581_vm0 = vmmov 0   ;;  %v57_v1 = vld [vmem:[#allocation5 + $0x78] sm:$0xff]  ;;  %v56_v2 = vld [vmem:[#allocation5 + $0x70] sm:$0xff] }
  0x1b   :  { %398 = vmatprep.subr.mxu0 %v580_v0  ;;  %430 = vmatprep.mubr.msk.f32.mxu0 %vm581_vm0, %v580_v0  ;;  %v55_v3 = vld [vmem:[#allocation5 + $0x68] sm:$0xff]  ;;  %v54_v4 = vld [vmem:[#allocation5 + $0x60] sm:$0xff]  ;;  %v151_v5 = vld [vmem:[#allocation5 + $0xf8] sm:$0xff]  ;;  %s582_s28 = smov [#allocation7]  }
  0x1c   :  { %433 = vmatprep.subr.mxu1 %v580_v0  ;;  %465 = vmatprep.mubr.msk.f32.mxu1 %vm581_vm0, %v580_v0  ;;  %v53_v6 = vld [vmem:[#allocation5 + $0x58] sm:$0xff]  ;;  %v150_v7 = vld [vmem:[#allocation5 + $0xf0] sm:$0xff]  ;;  %v149_v8 = vld [vmem:[#allocation5 + $0xe8] sm:$0xff]  ;;  %s332_s29 = sshll.u32 %s582_s28, 4  ;;  %s333_s29 = int_to_ptr.vmem [resolvable:$true] %s332_s29 }
  0x1d   :  { %399 = vmatpush3.msra.mxu0 %v57_v1  ;;  %434 = vmatpush3.msra.mxu1 %v151_v5  ;;  %v52_v9 = vld [vmem:[#allocation5 + $0x50] sm:$0xff]  ;;  %v148_v10 = vld [vmem:[#allocation5 + $0xe0] sm:$0xff]  ;;  %v51_v11 = vld [vmem:[#allocation5 + $0x48] sm:$0xff]  ;;  %s550_s30 = scalar_lea.vmem %s333_s29, 128  ;;  %p555_p11 = scmp.lt.s32.totalorder %s333_s29, %s333_s29 }
  0x1e   :  { %400 = vmatprep.subr.mxu0 %v580_v0  ;;  %435 = vmatprep.subr.mxu1 %v580_v0  ;;  %v147_v12 = vld [vmem:[#allocation5 + $0xd8] sm:$0xff]  ;;  %v50_v13 = vld [vmem:[#allocation5 + $0x40] sm:$0xff]  ;;  %v146_v14 = vld [vmem:[#allocation5 + $0xd0] sm:$0xff]  ;;  %p551_p10 = scmp.ne.s32.totalorder %s333_s29, %s550_s30  ;;  %p556_p12 = scmp.lt.s32.totalorder %s550_s30, %s550_s30 }
  0x1f   :  { %401 = vmatpush3.msra.mxu0 %v56_v2  ;;  %436 = vmatpush3.msra.mxu1 %v150_v7  ;;  %v49_v15 = vld [vmem:[#allocation5 + $0x38] sm:$0xff]  ;;  %v145_v16 = vld [vmem:[#allocation5 + $0xc8] sm:$0xff]  ;;  %v48_v17 = vld [vmem:[#allocation5 + $0x30] sm:$0xff] }
  0x20   :  { %402 = vmatprep.subr.mxu0 %v580_v0  ;;  %437 = vmatprep.subr.mxu1 %v580_v0  ;;  %v144_v18 = vld [vmem:[#allocation5 + $0xc0] sm:$0xff]  ;;  %v47_v19 = vld [vmem:[#allocation5 + $0x28] sm:$0xff]  ;;  %v143_v20 = vld [vmem:[#allocation5 + $0xb8] sm:$0xff]  ;;  %p557_p13 = por %p556_p12, %p555_p11 }
  0x21   :  { %403 = vmatpush3.msra.mxu0 %v55_v3  ;;  %438 = vmatpush3.msra.mxu1 %v149_v8  ;;  %v46_v21 = vld [vmem:[#allocation5 + $0x20] sm:$0xff]  ;;  %v142_v22 = vld [vmem:[#allocation5 + $0xb0] sm:$0xff]  ;;  %v45_v23 = vld [vmem:[#allocation5 + $0x18] sm:$0xff] }
  0x22   :  { %404 = vmatprep.subr.mxu0 %v580_v0  ;;  %439 = vmatprep.subr.mxu1 %v580_v0  ;;  %v141_v24 = vld [vmem:[#allocation5 + $0xa8] sm:$0xff]  ;;  %v44_v25 = vld [vmem:[#allocation5 + $0x10] sm:$0xff]  ;;  %v140_v26 = vld [vmem:[#allocation5 + $0xa0] sm:$0xff]  ;;  %p558_p0 = pnand %p557_p13, %p551_p10 }
  0x23   :  { %405 = vmatpush3.msra.mxu0 %v54_v4  ;;  %440 = vmatpush3.msra.mxu1 %v148_v10  ;;  %v43_v27 = vld [vmem:[#allocation5 + $0x8] sm:$0xff]  ;;  %v139_v28 = vld [vmem:[#allocation5 + $0x98] sm:$0xff]  ;;  %v42_v29 = vld [vmem:[#allocation5] sm:$0xff] }
  0x24   :  { %406 = vmatprep.subr.mxu0 %v580_v0  ;;  %441 = vmatprep.subr.mxu1 %v580_v0  ;;  %v41_v30 = vld [vmem:[#allocation2] sm:$0xff]  ;;  %v138_v31 = vld [vmem:[#allocation5 + $0x90] sm:$0xff]  ;;  %v137_v32 = vld [vmem:[#allocation5 + $0x88] sm:$0xff] }
  0x25   :  { %407 = vmatpush3.msra.mxu0 %v53_v6  ;;  %442 = vmatpush3.msra.mxu1 %v147_v12  ;;  %v136_v33 = vld [vmem:[#allocation5 + $0x80] sm:$0xff]  ;;  %v246_v34 = vld [vmem:[#allocation5 + $0x178] sm:$0xff]  ;;  %v245_v35 = vld [vmem:[#allocation5 + $0x170] sm:$0xff] }
  0x26   :  { %408 = vmatprep.subr.mxu0 %v580_v0  ;;  %443 = vmatprep.subr.mxu1 %v580_v0  ;;  %v244_v36 = vld [vmem:[#allocation5 + $0x168] sm:$0xff]  ;;  %v243_v37 = vld [vmem:[#allocation5 + $0x160] sm:$0xff]  ;;  %v242_v38 = vld [vmem:[#allocation5 + $0x158] sm:$0xff] }
  0x27   :  { %409 = vmatpush3.msra.mxu0 %v52_v9  ;;  %444 = vmatpush3.msra.mxu1 %v146_v14  ;;  %v241_v39 = vld [vmem:[#allocation5 + $0x150] sm:$0xff]  ;;  %v240_v40 = vld [vmem:[#allocation5 + $0x148] sm:$0xff]  ;;  %v239_v41 = vld [vmem:[#allocation5 + $0x140] sm:$0xff] }
  0x28   :  { %410 = vmatprep.subr.mxu0 %v580_v0  ;;  %445 = vmatprep.subr.mxu1 %v580_v0  ;;  %v238_v42 = vld [vmem:[#allocation5 + $0x138] sm:$0xff]  ;;  %v237_v43 = vld [vmem:[#allocation5 + $0x130] sm:$0xff]  ;;  %v236_v44 = vld [vmem:[#allocation5 + $0x128] sm:$0xff] }
  0x29   :  { %411 = vmatpush3.msra.mxu0 %v51_v11  ;;  %446 = vmatpush3.msra.mxu1 %v145_v16  ;;  %v235_v45 = vld [vmem:[#allocation5 + $0x120] sm:$0xff]  ;;  %v234_v46 = vld [vmem:[#allocation5 + $0x118] sm:$0xff]  ;;  %v233_v47 = vld [vmem:[#allocation5 + $0x110] sm:$0xff] }
  0x2a   :  { %412 = vmatprep.subr.mxu0 %v580_v0  ;;  %447 = vmatprep.subr.mxu1 %v580_v0  ;;  %v342_v48 = vld [vmem:[%s677_s2] ss:$0 sm:$0xff]  ;;  %v232_v52 = vld [vmem:[#allocation5 + $0x108] sm:$0xff]  ;;  %v231_v53 = vld [vmem:[#allocation5 + $0x100] sm:$0xff] }
  0x2b   :  { %413 = vmatpush3.msra.mxu0 %v50_v13  ;;  %448 = vmatpush3.msra.mxu1 %v144_v18  ;;  %v344_v54 = vld [vmem:[%s677_s2 + $0x1] ss:$0 sm:$0xff]  ;;  %v346_v58 = vld [vmem:[%s677_s2 + $0x2] ss:$0 sm:$0xff] }
  0x2c   :  { %414 = vmatprep.subr.mxu0 %v580_v0  ;;  %449 = vmatprep.subr.mxu1 %v580_v0 }
  0x2d   :  { %415 = vmatpush3.msra.mxu0 %v49_v15  ;;  %450 = vmatpush3.msra.mxu1 %v143_v20 }
  0x2e   :  { %416 = vmatprep.subr.mxu0 %v580_v0  ;;  %451 = vmatprep.subr.mxu1 %v580_v0 }
  0x2f   :  { %417 = vmatpush3.msra.mxu0 %v48_v17  ;;  %452 = vmatpush3.msra.mxu1 %v142_v22 }
  0x30   :  { %418 = vmatprep.subr.mxu0 %v580_v0  ;;  %453 = vmatprep.subr.mxu1 %v580_v0 }
  0x31   :  { %419 = vmatpush3.msra.mxu0 %v47_v19  ;;  %454 = vmatpush3.msra.mxu1 %v141_v24 }
  0x32   :  { %420 = vmatprep.subr.mxu0 %v580_v0  ;;  %455 = vmatprep.subr.mxu1 %v580_v0 }
  0x33   :  { %421 = vmatpush3.msra.mxu0 %v46_v21  ;;  %456 = vmatpush3.msra.mxu1 %v140_v26 }
  0x34   :  { %422 = vmatprep.subr.mxu0 %v580_v0  ;;  %457 = vmatprep.subr.mxu1 %v580_v0 }
  0x35   :  { %423 = vmatpush3.msra.mxu0 %v45_v23  ;;  %458 = vmatpush3.msra.mxu1 %v139_v28 }
  0x36   :  { %424 = vmatprep.subr.mxu0 %v580_v0  ;;  %459 = vmatprep.subr.mxu1 %v580_v0 }
  0x37   :  { %425 = vmatpush3.msra.mxu0 %v44_v25  ;;  %460 = vmatpush3.msra.mxu1 %v138_v31 }
  0x38   :  { %426 = vmatprep.subr.mxu0 %v580_v0  ;;  %461 = vmatprep.subr.mxu1 %v580_v0 }
  0x39   :  { %427 = vmatpush3.msra.mxu0 %v43_v27  ;;  %462 = vmatpush3.msra.mxu1 %v137_v32 }
  0x3a   :  { %428 = vmatprep.subr.mxu0 %v580_v0  ;;  %463 = vmatprep.subr.mxu1 %v580_v0 }
  0x3b   :  { %429 = vmatpush3.msra.mxu0 %v42_v29  ;;  %464 = vmatpush3.msra.mxu1 %v136_v33 }
  0x3c   :  { %431 = vmatmul.mubr.f32.vlgmr.msra.gmra.mxu0 %v41_v30  ;;  %468 = vmatprep.subr.mxu0 %v580_v0 }
  0x3d   :  { %500 = vmatprep.mubr.msk.f32.mxu0 %vm581_vm0, %v580_v0  ;;  %469 = vmatpush3.msra.mxu0 %v246_v34 }
  0x3e   :  { %470 = vmatprep.subr.mxu0 %v580_v0 }
  0x3f   :  { %471 = vmatpush3.msra.mxu0 %v245_v35 }
  0x40   :  { %472 = vmatprep.subr.mxu0 %v580_v0 }
  0x41   :  { %473 = vmatpush3.msra.mxu0 %v244_v36 }
  0x42   :  { %474 = vmatprep.subr.mxu0 %v580_v0 }
  0x43   :  { %475 = vmatpush3.msra.mxu0 %v243_v37 }
  0x44   :  { %476 = vmatprep.subr.mxu0 %v580_v0 }
  0x45   :  { %477 = vmatpush3.msra.mxu0 %v242_v38 }
  0x46   :  { %478 = vmatprep.subr.mxu0 %v580_v0 }
  0x47   :  { %479 = vmatpush3.msra.mxu0 %v241_v39 }
  0x48   :  { %480 = vmatprep.subr.mxu0 %v580_v0 }
  0x49   :  { %481 = vmatpush3.msra.mxu0 %v240_v40 }
  0x4a   :  { %482 = vmatprep.subr.mxu0 %v580_v0 }
  0x4b   :  { %483 = vmatpush3.msra.mxu0 %v239_v41 }
  0x4c   :  { %484 = vmatprep.subr.mxu0 %v580_v0 }
  0x4d   :  { %485 = vmatpush3.msra.mxu0 %v238_v42 }
  0x4e   :  { %486 = vmatprep.subr.mxu0 %v580_v0 }
  0x4f   :  { %487 = vmatpush3.msra.mxu0 %v237_v43 }
  0x50   :  { %488 = vmatprep.subr.mxu0 %v580_v0 }
  0x51   :  { %489 = vmatpush3.msra.mxu0 %v236_v44 }
  0x52   :  { %490 = vmatprep.subr.mxu0 %v580_v0 }
  0x53   :  { %491 = vmatpush3.msra.mxu0 %v235_v45 }
  0x54   :  { %492 = vmatprep.subr.mxu0 %v580_v0 }
  0x55   :  { %493 = vmatpush3.msra.mxu0 %v234_v46 }
  0x56   :  { %494 = vmatprep.subr.mxu0 %v580_v0 }
  0x57   :  { %495 = vmatpush3.msra.mxu0 %v233_v47 }
  0x58   :  { %496 = vmatprep.subr.mxu0 %v580_v0 }
  0x59   :  { %497 = vmatpush3.msra.mxu0 %v232_v52 }
  0x5a   :  { %498 = vmatprep.subr.mxu0 %v580_v0 }
  0x5b   :  { %499 = vmatpush3.msra.mxu0 %v231_v53 }
  0xfc   :  { %v131_v49 = vpop.f32.mrf.mxu0 }
  0xfd   :  { %v132_v50 = vadd.f32 %v342_v48, %v131_v49 }
  0xfe   :  { %v432_v51 = vpop.f32.mrf.mxu0 }
  0xff   :  { %466 = vmatmul.mubr.f32.vlgmr.msra.gmra.mxu1 %v132_v50 }
 0x1bf   :  { %v226_v55 = vpop.f32.mrf.mxu1 }
 0x1c0   :  { %v227_v56 = vadd.f32 %v344_v54, %v226_v55 }
 0x1c1   :  { %v467_v57 = vpop.f32.mrf.mxu1 }
 0x1c2   :  { %501 = vmatmul.mubr.f32.vlgmr.msra.gmra.mxu0 %v227_v56 }
 0x282   :  { %v321_v59 = vpop.f32.mrf.mxu0 }
 0x283   :  { %v322_v60 = vadd.f32 %v346_v58, %v321_v59 }
 0x284   :  { %v502_v61 = vpop.f32.mrf.mxu0 }
 0x285   :  { %325 = vst [vmem:[#allocation7] sm:$0xff] %v322_v60 }
 0x286   :  { %561 = shalt.err (!%p558_p0)
}
 0x287   :  { %335 = dma.vmem_to_hbm [thread:$0]  %s333_s29, 128, %s678_s3, [#allocation4]  }
 0x288   :  { %574 = dma.done.wait [#allocation4], 128  }
 0x289   :  { %575 = vsyncadd [#allocation4], 4294967168 }
 0x28a   :  { %339 = vsyncpa [#allocation3], 1 }
 0x28b   :  { %340 = vsyncpa [#allocation6], 1 }
 0x28c   :  { %341 = vsyncpa [#allocation4], 1 }

</bundles_post_ra>
